<compile_context>
chip_gen: v7x
topology: tpu7x:2x2x1
jax: 0.10.0
libtpu: 0.0.40
codegen_flags: <defaults>
</compile_context>

<pallas_src>
import jax
import jax.numpy as jnp
from jax.experimental import pallas as pl
from jax.experimental.pallas import tpu as pltpu


def _critic_kernel(s_ref, a_ref, w1s_ref, w1a_ref, b1_ref, w2_ref, b2_ref,
                   wq_ref, bq_ref, q_ref):
    # fc1: two MXU dots over the un-concatenated state/action tiles (the wrapper
    # no longer materialises a fused x in HBM); bf16 cast happens on-chip,
    # accumulation in f32.
    s_bf = s_ref[...].astype(jnp.bfloat16)
    a_bf = a_ref[...].astype(jnp.bfloat16)
    h1 = jnp.dot(s_bf, w1s_ref[...], preferred_element_type=jnp.float32)
    h1 = h1 + jnp.dot(a_bf, w1a_ref[...], preferred_element_type=jnp.float32)
    h1 = jnp.maximum(h1 + b1_ref[...], 0.0)

    # fc2 + ReLU (bf16 MXU inputs, f32 accumulation).
    h2 = jnp.dot(h1.astype(jnp.bfloat16), w2_ref[...],
                 preferred_element_type=jnp.float32)
    h2 = jnp.maximum(h2 + b2_ref[...], 0.0)

    # q head (out_features == 1): VPU multiply + lane reduction instead of an
    # N=1 MXU matmul; scalar bias from SMEM; lane-dense (1, TB) store (the
    # sublane->lane relayout rides the otherwise-idle XLU slot).
    q = jnp.sum(h2 * wq_ref[...], axis=-1) + bq_ref[0]       # (TB,)
    q_ref[...] = q.reshape(q_ref.shape)


def _round_up(v, m):
    return (v + m - 1) // m * m


def _cdiv(a, b):
    return -(-a // b)


def _prepare_params(params, state_dim):
    """Split w1 into state/action parts, pad feature dims to 128-multiples."""
    w1, b1, w2, b2, wq, bq = (params[k] for k in ("w1", "b1", "w2", "b2", "wq", "bq"))
    K, F1 = w1.shape
    F1_, F2 = w2.shape
    assert F1_ == F1, (w1.shape, w2.shape)
    assert wq.shape == (F2, 1), f"wq must be (fc2_dims, 1), got {wq.shape}"
    S = state_dim
    A = K - S
    assert A > 0, "obs_space must equal state_dim + action_dim"

    F1p = _round_up(F1, 128)
    F2p = _round_up(F2, 128)
    pad2 = lambda m, r, c: jnp.pad(m, ((0, r - m.shape[0]), (0, c - m.shape[1])))

    w1p = pad2(w1.astype(jnp.float32), K, F1p)
    w1s = w1p[:S].astype(jnp.bfloat16)                       # (S,  F1p) resident
    w1a = w1p[S:].astype(jnp.bfloat16)                       # (A,  F1p) resident
    b1p = pad2(b1.reshape(1, F1).astype(jnp.float32), 1, F1p)
    w2p = pad2(w2.astype(jnp.float32), F1p, F2p).astype(jnp.bfloat16)
    b2p = pad2(b2.reshape(1, F2).astype(jnp.float32), 1, F2p)
    wq_row = pad2(wq.reshape(F2, 1).astype(jnp.float32), F2p, 1).reshape(1, F2p)
    bq_s = bq.reshape(1).astype(jnp.float32)                 # scalar -> SMEM
    return w1s, w1a, b1p, w2p, b2p, wq_row, bq_s, F1p, F2p


def critic_forward(state, action, params, *, batch_tile=1024):
    """state: (B, S) f32, action: (B, A) f32 -> q: (B, 1) f32."""
    B, S = state.shape
    A = action.shape[1]
    w1s, w1a, b1, w2, b2, wq_row, bq_s, F1p, F2p = _prepare_params(params, S)

    # Batch tiling: big tiles amortise the ~0.35us/step grid overhead; once the
    # batch is large enough, force >=2 tiles so v7x's second TensorCore gets
    # work ("parallel" grid axis).
    if B > 512:
        TB = max(256, min(batch_tile, _round_up(_cdiv(B, 2), 256)))
    else:
        TB = _round_up(B, 16)          # bf16 packs 16 rows per vreg
    n_tiles = _cdiv(B, TB)

    # Only tiny batches (B < one tile) get wrapper padding (<=15 rows, cheap).
    # Large batches stream state/action from HBM unpadded; the trailing partial
    # tile relies on Pallas out-of-bounds masking and is sliced off below.
    if TB > B:
        state = jnp.pad(state, ((0, TB - B), (0, 0)))
        action = jnp.pad(action, ((0, TB - B), (0, 0)))
    state = state.astype(jnp.float32)
    action = action.astype(jnp.float32)

    grid_spec = pltpu.PrefetchScalarGridSpec(
        num_scalar_prefetch=0,
        grid=(n_tiles,),
        in_specs=[
            pl.BlockSpec((TB, S), lambda i: (i, 0)),         # streamed state tile
            pl.BlockSpec((TB, A), lambda i: (i, 0)),         # streamed action tile
            pl.BlockSpec((S, F1p), lambda i: (0, 0)),        # resident weights
            pl.BlockSpec((A, F1p), lambda i: (0, 0)),
            pl.BlockSpec((1, F1p), lambda i: (0, 0)),
            pl.BlockSpec((F1p, F2p), lambda i: (0, 0)),
            pl.BlockSpec((1, F2p), lambda i: (0, 0)),
            pl.BlockSpec((1, F2p), lambda i: (0, 0)),
            pl.BlockSpec(memory_space=pltpu.MemorySpace.SMEM),   # bq scalar
        ],
        out_specs=pl.BlockSpec((1, TB), lambda i: (i, 0)),
    )

    q_slab = pl.pallas_call(
        _critic_kernel,
        out_shape=jax.ShapeDtypeStruct((n_tiles, TB), jnp.float32),
        grid_spec=grid_spec,
        compiler_params=pltpu.CompilerParams(
            dimension_semantics=("parallel",)),               # megacore sharding on v7x
    )(state, action, w1s, w1a, b1, w2, b2, wq_row, bq_s)

    # (n_tiles, TB) lane-dense slab -> (B, 1), dropping any padding / OOB rows.
    return q_slab.reshape(n_tiles * TB, 1)[:B]


def init_params(key, state_dim, action_dim, fc1_dims, fc2_dims):
    """Deterministic synthetic parameters (nn.Linear shapes, pre-transposed to (in, out))."""
    obs_space = state_dim + action_dim
    k = jax.random.split(key, 6)
    scale = lambda fan_in: 1.0 / jnp.sqrt(jnp.float32(fan_in))
    u = lambda kk, shape: jax.random.uniform(kk, shape, jnp.float32, -1, 1)
    return {
        "w1": u(k[0], (obs_space, fc1_dims)) * scale(obs_space),
        "b1": u(k[1], (1, fc1_dims)) * scale(obs_space),
        "w2": u(k[2], (fc1_dims, fc2_dims)) * scale(fc1_dims),
        "b2": u(k[3], (1, fc2_dims)) * scale(fc1_dims),
        "wq": u(k[4], (fc2_dims, 1)) * scale(fc2_dims),
        "bq": u(k[5], (1, 1)) * scale(fc2_dims),
    }


def critic_reference(state, action, params):
    """Pure-JAX reference with the same bf16-matmul / f32-accumulate numerics."""
    S = state.shape[1]
    w1, b1, w2, b2, wq, bq = (params[k] for k in ("w1", "b1", "w2", "b2", "wq", "bq"))
    s_bf = state.astype(jnp.bfloat16)
    a_bf = action.astype(jnp.bfloat16)
    h1 = (jnp.dot(s_bf, w1[:S].astype(jnp.bfloat16), preferred_element_type=jnp.float32)
          + jnp.dot(a_bf, w1[S:].astype(jnp.bfloat16), preferred_element_type=jnp.float32)
          + b1)
    h1 = jnp.maximum(h1, 0.0)
    h2 = jnp.dot(h1.astype(jnp.bfloat16), w2.astype(jnp.bfloat16),
                 preferred_element_type=jnp.float32) + b2
    h2 = jnp.maximum(h2, 0.0)
    return h2 @ wq + bq


if __name__ == "__main__":
    key = jax.random.PRNGKey(0)
    k_s, k_a, k_p = jax.random.split(key, 3)

    # small shapes consistent with the module's forward (obs_space = 24 + 8 = 32)
    batch, state_dim, action_dim = 8, 24, 8
    fc1_dims, fc2_dims = 128, 128

    state = jax.random.normal(k_s, (batch, state_dim), jnp.float32)
    action = jax.random.normal(k_a, (batch, action_dim), jnp.float32)
    params = init_params(k_p, state_dim, action_dim, fc1_dims, fc2_dims)

    q = critic_forward(state, action, params)
    jax.block_until_ready(q)

    q_ref = critic_reference(state, action, params)
    assert q.shape == (batch, 1)
    assert jnp.allclose(q, q_ref, atol=1e-3, rtol=1e-3), \
        float(jnp.max(jnp.abs(q - q_ref)))

    print("KERNEL_OK")
</pallas_src>

<mosaic_0001>
module attributes {stable_mosaic.version = 11 : i64} {
  func.func @_critic_kernel(%arg0: i32, %arg1: memref<16x24xf32, #tpu.memory_space<vmem>>, %arg2: memref<16x8xf32, #tpu.memory_space<vmem>>, %arg3: memref<24x128xbf16, #tpu.memory_space<vmem>>, %arg4: memref<8x128xbf16, #tpu.memory_space<vmem>>, %arg5: memref<1x128xf32, #tpu.memory_space<vmem>>, %arg6: memref<128x128xbf16, #tpu.memory_space<vmem>>, %arg7: memref<1x128xf32, #tpu.memory_space<vmem>>, %arg8: memref<1x128xf32, #tpu.memory_space<vmem>>, %arg9: memref<1xf32, #tpu.memory_space<smem>>, %arg10: memref<1x16xf32, #tpu.memory_space<vmem>>) attributes {dimension_semantics = [#tpu.dimension_semantics<parallel>], iteration_bounds = array<i64: 1>, scalar_prefetch = 0 : i64, scratch_operands = 0 : i64, tpu.core_type = #tpu.core_type<tc>, window_params = [{transform_indices = @transform_0, window_bounds = array<i64: 16, 24>}, {transform_indices = @transform_1, window_bounds = array<i64: 16, 8>}, {pipeline_mode = #tpu.pipeline_mode<synchronous>, transform_indices = @transform_2, window_bounds = array<i64: 24, 128>}, {pipeline_mode = #tpu.pipeline_mode<synchronous>, transform_indices = @transform_3, window_bounds = array<i64: 8, 128>}, {pipeline_mode = #tpu.pipeline_mode<synchronous>, transform_indices = @transform_4, window_bounds = array<i64: 1, 128>}, {pipeline_mode = #tpu.pipeline_mode<synchronous>, transform_indices = @transform_5, window_bounds = array<i64: 128, 128>}, {pipeline_mode = #tpu.pipeline_mode<synchronous>, transform_indices = @transform_6, window_bounds = array<i64: 1, 128>}, {pipeline_mode = #tpu.pipeline_mode<synchronous>, transform_indices = @transform_7, window_bounds = array<i64: 1, 128>}, {transform_indices = @transform_8, window_bounds = array<i64: 1>}, {transform_indices = @transform_9, window_bounds = array<i64: 1, 16>}]} {
    %c0 = arith.constant 0 : index
    %c0_0 = arith.constant 0 : index
    %0 = vector.load %arg1[%c0, %c0_0] : memref<16x24xf32, #tpu.memory_space<vmem>>, vector<16x24xf32>
    %1 = arith.truncf %0 : vector<16x24xf32> to vector<16x24xbf16>
    %c0_1 = arith.constant 0 : index
    %c0_2 = arith.constant 0 : index
    %2 = vector.load %arg2[%c0_1, %c0_2] : memref<16x8xf32, #tpu.memory_space<vmem>>, vector<16x8xf32>
    %3 = arith.truncf %2 : vector<16x8xf32> to vector<16x8xbf16>
    %c0_3 = arith.constant 0 : index
    %c0_4 = arith.constant 0 : index
    %4 = vector.load %arg3[%c0_3, %c0_4] : memref<24x128xbf16, #tpu.memory_space<vmem>>, vector<24x128xbf16>
    %cst = arith.constant dense<0.000000e+00> : vector<16x128xf32>
    %5 = tpu.matmul %1, %4, %cst {dimension_numbers = #tpu.dot_dimension_numbers<[1], [0], [0], [1], [0, 0, 1, 1], [], []>} : vector<16x24xbf16>, vector<24x128xbf16>, vector<16x128xf32> -> vector<16x128xf32>
    %c0_5 = arith.constant 0 : index
    %c0_6 = arith.constant 0 : index
    %6 = vector.load %arg4[%c0_5, %c0_6] : memref<8x128xbf16, #tpu.memory_space<vmem>>, vector<8x128xbf16>
    %cst_7 = arith.constant dense<0.000000e+00> : vector<16x128xf32>
    %7 = tpu.matmul %3, %6, %cst_7 {dimension_numbers = #tpu.dot_dimension_numbers<[1], [0], [0], [1], [0, 0, 1, 1], [], []>} : vector<16x8xbf16>, vector<8x128xbf16>, vector<16x128xf32> -> vector<16x128xf32>
    %8 = arith.addf %5, %7 : vector<16x128xf32>
    %c0_8 = arith.constant 0 : index
    %c0_9 = arith.constant 0 : index
    %9 = vector.load %arg5[%c0_8, %c0_9] : memref<1x128xf32, #tpu.memory_space<vmem>>, vector<1x128xf32>
    %10 = vector.broadcast %9 : vector<1x128xf32> to vector<16x128xf32>
    %11 = arith.addf %8, %10 : vector<16x128xf32>
    %cst_10 = arith.constant 0.000000e+00 : f32
    %12 = vector.broadcast %cst_10 : f32 to vector<16x128xf32>
    %13 = arith.maximumf %11, %12 : vector<16x128xf32>
    %14 = arith.truncf %13 : vector<16x128xf32> to vector<16x128xbf16>
    %c0_11 = arith.constant 0 : index
    %c0_12 = arith.constant 0 : index
    %15 = vector.load %arg6[%c0_11, %c0_12] : memref<128x128xbf16, #tpu.memory_space<vmem>>, vector<128x128xbf16>
    %cst_13 = arith.constant dense<0.000000e+00> : vector<16x128xf32>
    %16 = tpu.matmul %14, %15, %cst_13 {dimension_numbers = #tpu.dot_dimension_numbers<[1], [0], [0], [1], [0, 0, 1, 1], [], []>} : vector<16x128xbf16>, vector<128x128xbf16>, vector<16x128xf32> -> vector<16x128xf32>
    %c0_14 = arith.constant 0 : index
    %c0_15 = arith.constant 0 : index
    %17 = vector.load %arg7[%c0_14, %c0_15] : memref<1x128xf32, #tpu.memory_space<vmem>>, vector<1x128xf32>
    %18 = vector.broadcast %17 : vector<1x128xf32> to vector<16x128xf32>
    %19 = arith.addf %16, %18 : vector<16x128xf32>
    %cst_16 = arith.constant 0.000000e+00 : f32
    %20 = vector.broadcast %cst_16 : f32 to vector<16x128xf32>
    %21 = arith.maximumf %19, %20 : vector<16x128xf32>
    %c0_17 = arith.constant 0 : index
    %c0_18 = arith.constant 0 : index
    %22 = vector.load %arg8[%c0_17, %c0_18] : memref<1x128xf32, #tpu.memory_space<vmem>>, vector<1x128xf32>
    %23 = vector.broadcast %22 : vector<1x128xf32> to vector<16x128xf32>
    %24 = arith.mulf %21, %23 : vector<16x128xf32>
    %cst_19 = arith.constant dense<0.000000e+00> : vector<16xf32>
    %25 = vector.multi_reduction <add>, %24, %cst_19 [1] : vector<16x128xf32> to vector<16xf32>
    %c0_20 = arith.constant 0 : index
    %26 = memref.load %arg9[%c0_20] : memref<1xf32, #tpu.memory_space<smem>>
    %27 = vector.broadcast %26 : f32 to vector<16xf32>
    %28 = arith.addf %25, %27 : vector<16xf32>
    %29 = vector.shape_cast %28 : vector<16xf32> to vector<1x16xf32>
    %c0_21 = arith.constant 0 : index
    %c0_22 = arith.constant 0 : index
    %30 = vector.load %arg10[%c0_21, %c0_22] : memref<1x16xf32, #tpu.memory_space<vmem>>, vector<1x16xf32>
    tpu.vector_store %arg10[%c0_21, %c0_22], %29 {strides = array<i32>} : memref<1x16xf32, #tpu.memory_space<vmem>>, vector<1x16xf32>,
    return
  }
  func.func @transform_0(%arg0: i32) -> (i32, i32) {
    %c0_i32 = arith.constant 0 : i32
    %c0_i32_0 = arith.constant 0 : i32
    return %arg0, %c0_i32 : i32, i32
  }
  func.func @transform_1(%arg0: i32) -> (i32, i32) {
    %c0_i32 = arith.constant 0 : i32
    %c0_i32_0 = arith.constant 0 : i32
    return %arg0, %c0_i32 : i32, i32
  }
  func.func @transform_2(%arg0: i32) -> (i32, i32) {
    %c0_i32 = arith.constant 0 : i32
    %c0_i32_0 = arith.constant 0 : i32
    %c0_i32_1 = arith.constant 0 : i32
    return %c0_i32, %c0_i32_0 : i32, i32
  }
  func.func @transform_3(%arg0: i32) -> (i32, i32) {
    %c0_i32 = arith.constant 0 : i32
    %c0_i32_0 = arith.constant 0 : i32
    %c0_i32_1 = arith.constant 0 : i32
    return %c0_i32, %c0_i32_0 : i32, i32
  }
  func.func @transform_4(%arg0: i32) -> (i32, i32) {
    %c0_i32 = arith.constant 0 : i32
    %c0_i32_0 = arith.constant 0 : i32
    %c0_i32_1 = arith.constant 0 : i32
    return %c0_i32, %c0_i32_0 : i32, i32
  }
  func.func @transform_5(%arg0: i32) -> (i32, i32) {
    %c0_i32 = arith.constant 0 : i32
    %c0_i32_0 = arith.constant 0 : i32
    %c0_i32_1 = arith.constant 0 : i32
    return %c0_i32, %c0_i32_0 : i32, i32
  }
  func.func @transform_6(%arg0: i32) -> (i32, i32) {
    %c0_i32 = arith.constant 0 : i32
    %c0_i32_0 = arith.constant 0 : i32
    %c0_i32_1 = arith.constant 0 : i32
    return %c0_i32, %c0_i32_0 : i32, i32
  }
  func.func @transform_7(%arg0: i32) -> (i32, i32) {
    %c0_i32 = arith.constant 0 : i32
    %c0_i32_0 = arith.constant 0 : i32
    %c0_i32_1 = arith.constant 0 : i32
    return %c0_i32, %c0_i32_0 : i32, i32
  }
  func.func @transform_8(%arg0: i32) -> i32 {
    %c0_i32 = arith.constant 0 : i32
    %c0_i32_0 = arith.constant 0 : i32
    return %c0_i32 : i32
  }
  func.func @transform_9(%arg0: i32) -> (i32, i32) {
    %c0_i32 = arith.constant 0 : i32
    %c0_i32_0 = arith.constant 0 : i32
    return %arg0, %c0_i32 : i32, i32
  }
}

</mosaic_0001>

<bundles_post_ra>
// kernel: tpu_custom_call.1
= control target key start
LH: loop header
LB: loop body
LE: loop exit
PB: predicated region body
PF: predicated region fallthrough
CT: control target
= control target key end

     0   :  { %15 = vsyncpa [#allocation4], 0  ;;  %s584_s0 = inlined_call_operand.vmem [shape: f32[16,24], index: 0, kind: input, shape index: {}]   ;;  %s585_s1 = inlined_call_operand.vmem [shape: f32[16,8], index: 1, kind: input, shape index: {}]   ;;  %s586_s2 = inlined_call_operand.vmem [shape: bf16[24,128], index: 2, kind: input, shape index: {}]   ;;  %s587_s3 = inlined_call_operand.vmem [shape: bf16[8,128], index: 3, kind: input, shape index: {}]   ;;  %s588_s4 = inlined_call_operand.vmem [shape: f32[1,128], index: 4, kind: input, shape index: {}]   ;;  %s589_s5 = inlined_call_operand.hbm [shape: bf16[128,128], index: 5, kind: input, shape index: {}]   ;;  %s590_s6 = inlined_call_operand.vmem [shape: f32[1,128], index: 6, kind: input, shape index: {}]   ;;  %s591_s7 = inlined_call_operand.vmem [shape: f32[1,128], index: 7, kind: input, shape index: {}]   ;;  %s592_s8 = inlined_call_operand.<no memory space> [shape: f32[1], index: 8, kind: input, shape index: {}]   ;;  %s593_s9 = inlined_call_operand.hbm [shape: f32[1,16], index: 9, kind: output, shape index: {}]  }
   0x1   :  { %16 = vsyncpa [#allocation5], 0  ;;  %s468_s30 = smov [#allocation3]   ;;  %s420_s13 = scalar_lea.hbm %s589_s5, 1024 }
   0x2   :  { %s32_s10 = sshll.u32 %s468_s30, 4  ;;  %p421_p0 = scmp.ne.s32.totalorder %s589_s5, %s420_s13  ;;  %s33_s10 = int_to_ptr.vmem [resolvable:$true] %s32_s10 }
   0x3   :  { %p424_p1 = scmp.lt.u32.totalorder %s420_s13, %s589_s5 }
   0x5   :  { %p426_p2 = pnand %p424_p1, %p421_p0 }
   0x7   :  { %429 = shalt.err (!%p426_p2)
}
   0x8   :  { %s430_s18 = scalar_lea.vmem %s33_s10, 1024  ;;  %p435_p4 = scmp.lt.s32.totalorder %s33_s10, %s33_s10 }
   0x9   :  { %p431_p3 = scmp.ne.s32.totalorder %s33_s10, %s430_s18  ;;  %p436_p5 = scmp.lt.s32.totalorder %s430_s18, %s430_s18 }
   0xb   :  { %p437_p6 = por %p436_p5, %p435_p4 }
   0xd   :  { %p438_p7 = pnand %p437_p6, %p431_p3 }
   0xf   :  { %441 = shalt.err (!%p438_p7)
}
  0x10   :  { %s469_s19 = smov 64   ;;  %s470_s20 = smov 4  }
  0x11   :  { %38 = dma.hbm_to_vmem [thread:$0]  %s589_s5, 1024, %s33_s10, [#allocation4], %s469_s19, %s469_s19, %s470_s20  }
  0x12   :  { %464 = dma.done.wait [#allocation4], 1024  }
  0x13   :  { %465 = vsyncadd [#allocation4], 4294966272  ;;  %v471_v0 = vmov 0.0   ;;  %vm472_vm0 = vmmov 0   ;;  %vm63_vm1 = vcmask 1043456   ;;  %v52_v3 = vld [vmem:[%s585_s1] sm:$0xff]  ;;  %v310_v48 = vlaneseq }
  0x14   :  { %370 = vmatprep.subr.bf16.mxu1 %v471_v0  ;;  %372 = vmatprep.mubr.msk.bf16.mxu1 %vm472_vm0, %v471_v0  ;;  %v58_v1 = vld [vmem:[%s587_s3] sm:$0xf]  ;;  %v53_v4 = vld [vmem:[%s585_s1 + $0x8] sm:$0xff]  ;;  %vm59_vm2 = vcmask 64512   ;;  %vm117_vm3 = vcmask 195584   ;;  %v414_v14 = vld [vmem:[#allocation3 + $0x10] sm:$0xff]   ;;  %v305_v52 = vstv %s592_s8 }
  0x15   :  { %384 = vmatprep.subr.bf16.mxu0 %v471_v0  ;;  %400 = vmatprep.mubr.msk.bf16.mxu0 %vm472_vm0, %v471_v0  ;;  %v65_v2 = vsel %vm63_vm1, %v58_v1, 0  ;;  %v410_v5 = vld [vmem:[%s586_s2 + $0x8] ss:$0 sps:$4 sm:$0xff]   ;;  %v54_v6 = vpack.c.bf16 %v53_v4, %v52_v3  ;;  %v411_v7 = vld [vmem:[%s586_s2] sm:$0xff]   ;;  %v415_v15 = vld [vmem:[#allocation3 + $0x18] sm:$0xff]   ;;  %v311_v49 = vand.u32 127, %v310_v48 }
  0x16   :  { %371 = vmatpush3.bf16.msra.mxu1 %v65_v2  ;;  %v49_v8 = vld [vmem:[%s584_s0] sm:$0xff]  ;;  %v50_v10 = vld [vmem:[%s584_s0 + $0x8] sm:$0xff]  ;;  %v122_v11 = vsel %vm63_vm1, %v410_v5, 0  ;;  %v418_v18 = vld [vmem:[#allocation3 + $0x30] sm:$0xff]   ;;  %v313_v50 = vshrl.u32 %v310_v48, 7  ;;  %vm321_vm4 = vcmask 130112  }
  0x17   :  { %376 = vmatprep.subr.bf16.mxu1 %v471_v0  ;;  %v412_v9 = vld [vmem:[#allocation3] sm:$0xff]   ;;  %v413_v12 = vld [vmem:[#allocation3 + $0x8] sm:$0xff]   ;;  %v51_v13 = vpack.c.bf16 %v50_v10, %v49_v8  ;;  %v419_v19 = vld [vmem:[#allocation3 + $0x38] sm:$0xff]   ;;  %v316_v51 = vadd.s32 4294967288, %v311_v49  ;;  %vm324_vm5 = vcmask 122880  }
  0x18   :  { %385 = vmatpush3.bf16.msra.mxu0 %v412_v9  ;;  %v416_v16 = vld [vmem:[#allocation3 + $0x20] sm:$0xff]   ;;  %v417_v17 = vld [vmem:[#allocation3 + $0x28] sm:$0xff]   ;;  %v314_v54 = vsub.s32 %v311_v49, %v313_v50 }
  0x19   :  { %373 = vmatmul.mubr.msk.bf16.vlgmr.msra.gmra.mrb[0].mxu1 %vm59_vm2, %v54_v6  ;;  %386 = vmatprep.subr.bf16.mxu0 %v471_v0  ;;  %v345_v25 = vld [vmem:[%s588_s4] ss:$0 sm:$0xff]  ;;  %v319_v56 = vsub.s32 %v316_v51, %v313_v50 }
  0x1a   :  { %377 = vmatpush3.bf16.msra.mxu1 %v411_v7  ;;  %380 = vmatprep.mubr.msk.bf16.mxu1 %vm472_vm0, %v471_v0  ;;  %v346_v36 = vld [vmem:[%s590_s6] ss:$0 sm:$0xff] }
  0x1b   :  { %378 = vmatprep.subr.bf16.mxu1 %v471_v0  ;;  %v355_v41 = vld [vmem:[%s591_s7] ss:$0 sm:$0xff]  ;;  %s473_s7 = smov [#allocation6]  }
  0x1c   :  { %387 = vmatpush3.bf16.msra.mxu0 %v413_v12  ;;  %s332_s17 = sshll.u32 %s473_s7, 4  ;;  %s333_s17 = int_to_ptr.vmem [resolvable:$true] %s332_s17 }
  0x1d   :  { %388 = vmatprep.subr.bf16.mxu0 %v471_v0  ;;  %s442_s18 = scalar_lea.vmem %s333_s17, 16  ;;  %s446_s19 = scalar_lea.vmem %s333_s17, 32 }
  0x1e   :  { %379 = vmatpush3.bf16.msra.mxu1 %v122_v11  ;;  %p443_p8 = scmp.ne.s32.totalorder %s333_s17, %s442_s18  ;;  %p447_p9 = scmp.lt.s32.totalorder %s333_s17, %s333_s17 }
  0x1f   :  { %p448_p10 = scmp.lt.s32.totalorder %s446_s19, %s442_s18 }
  0x20   :  { %389 = vmatpush3.bf16.msra.mxu0 %v414_v14 }
  0x21   :  { %381 = vmatmul.mubr.msk.bf16.vlgmr.msra.gmra.mrb[4].mxu1 %vm117_vm3, %v51_v13  ;;  %390 = vmatprep.subr.bf16.mxu0 %v471_v0  ;;  %p449_p11 = por %p448_p10, %p447_p9 }
  0x23   :  { %p450_p12 = pnand %p449_p11, %p443_p8 }
  0x24   :  { %391 = vmatpush3.bf16.msra.mxu0 %v415_v15 }
  0x25   :  { %392 = vmatprep.subr.bf16.mxu0 %v471_v0 }
  0x28   :  { %393 = vmatpush3.bf16.msra.mxu0 %v416_v16 }
  0x29   :  { %394 = vmatprep.subr.bf16.mxu0 %v471_v0 }
  0x2c   :  { %395 = vmatpush3.bf16.msra.mxu0 %v417_v17 }
  0x2d   :  { %396 = vmatprep.subr.bf16.mxu0 %v471_v0 }
  0x30   :  { %397 = vmatpush3.bf16.msra.mxu0 %v418_v18 }
  0x31   :  { %398 = vmatprep.subr.bf16.mxu0 %v471_v0 }
  0x34   :  { %399 = vmatpush3.bf16.msra.mxu0 %v419_v19 }
  0xec   :  { %v101_v20 = vpop.f32.mrb[0].mxu1 }
  0xed   :  { %v374_v21 = vpop.f32.mrb[1].mxu1 }
  0xee   :  { %v104_v22 = vpop.f32.mrb[2].mxu1 }
  0xef   :  { %v375_v23 = vpop.f32.mrb[3].mxu1 }
  0xf4   :  { %v158_v24 = vpop.f32.mrb[4].mxu1 }
  0xf5   :  { %v159_v26 = vadd.f32 %v158_v24, %v101_v20  ;;  %v382_v27 = vpop.f32.mrb[5].mxu1 }
  0xf6   :  { %v161_v28 = vpop.f32.mrb[6].mxu1 }
  0xf7   :  { %v172_v29 = vadd.f32 %v345_v25, %v159_v26  ;;  %v162_v30 = vadd.f32 %v161_v28, %v104_v22  ;;  %v383_v31 = vpop.f32.mrb[7].mxu1 }
  0xf9   :  { %v173_v32 = vadd.f32 %v345_v25, %v162_v30  ;;  %v174_v33 = vmax.f32 %v172_v29, 0.0 }
  0xfb   :  { %v175_v34 = vmax.f32 %v173_v32, 0.0 }
  0xfd   :  { %v176_v35 = vpack.c.bf16 %v175_v34, %v174_v33 }
  0xff   :  { %401 = vmatmul.mubr.bf16.vlgmr.msra.gmra.mrb[0].mxu0 %v176_v35 }
 0x1d2   :  { %v282_v37 = vpop.f32.mrb[0].mxu0 }
 0x1d3   :  { %v283_v38 = vadd.f32 %v346_v36, %v282_v37  ;;  %v402_v39 = vpop.f32.mrb[1].mxu0 }
 0x1d4   :  { %v285_v40 = vpop.f32.mrb[2].mxu0 }
 0x1d5   :  { %v289_v42 = vmax.f32 %v283_v38, 0.0  ;;  %v286_v43 = vadd.f32 %v346_v36, %v285_v40  ;;  %v403_v44 = vpop.f32.mrb[3].mxu0 }
 0x1d7   :  { %v290_v45 = vmax.f32 %v286_v43, 0.0  ;;  %v298_v46 = vmul.f32 %v355_v41, %v289_v42 }
 0x1d9   :  { %300 = vadd.xlane.f32.xlu0 %v298_v46  ;;  %v299_v47 = vmul.f32 %v355_v41, %v290_v45 }
 0x1dd   :  { %302 = vadd.xlane.f32.xlu0 %v299_v47 }
 0x266   :  { %v301_v53 = vpop.xlane.xlu0 %300 }
 0x267   :  { %v306_v55 = vadd.f32 %v305_v52, %v301_v53 }
 0x269   :  { %v315_v59 = vrot.slane %v306_v55, %v314_v54 }
 0x26a   :  { %v303_v57 = vpop.xlane.xlu0 %302 }
 0x26b   :  { %v307_v58 = vadd.f32 %v305_v52, %v303_v57 }
 0x26d   :  { %v320_v60 = vrot.slane %v307_v58, %v319_v56 }
 0x26f   :  { %v322_v61 = vsel %vm321_vm4, %v320_v60, %v315_v59 }
 0x270   :  { %325 = vst.msk [vmem:[#allocation6] sm:$0x1] %vm324_vm5, %v322_v61 }
 0x271   :  { %453 = shalt.err (!%p450_p12)
}
 0x272   :  { %s454_s21 = scalar_lea.hbm %s593_s9, 16 }
 0x273   :  { %p455_p13 = scmp.ne.s32.totalorder %s593_s9, %s454_s21  ;;  %p458_p0 = scmp.lt.u32.totalorder %s454_s21, %s593_s9 }
 0x275   :  { %p460_p1 = pnand %p458_p0, %p455_p13 }
 0x277   :  { %463 = shalt.err (!%p460_p1)
}
 0x278   :  { %335 = dma.vmem_to_hbm [thread:$0]  %s333_s17, 16, %s593_s9, [#allocation5]  }
 0x279   :  { %466 = dma.done.wait [#allocation5], 16  }
 0x27a   :  { %467 = vsyncadd [#allocation5], 4294967280 }
 0x27b   :  { %339 = vsyncpa [#allocation4], 1 }
 0x27c   :  { %340 = vsyncpa [#allocation5], 1 }

</bundles_post_ra>
